<compile_context>
chip_gen: v6e
topology: v6e:2x2x1
jax: 0.10.0
libtpu: 0.0.40
codegen_flags: <defaults>
</compile_context>

<pallas_src>
import functools

import jax
import jax.numpy as jnp
from jax.experimental import pallas as pl
from jax.experimental.pallas import tpu as pltpu


def _rmsnorm_kernel(x_ref, w_ref, o_ref, *, eps: float, inv_dim: float):
    # x_ref: (block_rows, dim) tile of the flattened input (dim = true width,
    #        Mosaic masks the tail vreg when dim % 128 != 0).
    # w_ref: (1, dim) f32 weight with the unit offset already folded in.
    x = x_ref[...].astype(jnp.float32)                       # matches x.float()
    ms = jnp.sum(x * x, axis=-1, keepdims=True) * inv_dim    # mean over true dim
    inv = jax.lax.rsqrt(ms + eps)                            # rsqrt(ms + eps)
    # Recompute the cast for the scaling pass so the full f32 copy need not
    # stay live across both the reduction and the scale.
    o_ref[...] = (x_ref[...].astype(jnp.float32) * inv * w_ref[...]).astype(o_ref.dtype)


def _tpu_vmem_and_cores():
    """Best-effort query of physical per-core VMEM bytes and TensorCores/chip."""
    vmem = 64 * 1024 * 1024  # conservative default (v7x per-TC VMEM)
    num_tc = 1
    try:
        info = pltpu.get_tpu_info()
        vmem = int(getattr(info, "vmem_capacity_bytes", vmem) or vmem)
        for attr in ("num_tensorcores", "tensorcore_count", "num_cores",
                     "cores_per_chip"):
            v = getattr(info, attr, None)
            if v:
                num_tc = int(v)
                break
    except Exception:
        pass
    if num_tc == 1:
        try:
            num_tc = max(1, int(getattr(jax.devices()[0], "num_cores", 1) or 1))
        except Exception:
            pass
    return vmem, num_tc


def _choose_block_rows(rows: int, dim: int, dtype, budget_bytes: int,
                       num_tc: int) -> int:
    """Biggest 16-aligned row tile fitting the VMEM tile budget (no row cap)."""
    itemsize = jnp.dtype(dtype).itemsize
    dim_p = ((dim + 127) // 128) * 128  # lane-padded width inside VMEM
    # Per row: double-buffered input block + double-buffered output block +
    # one streaming f32 temporary (f32 copy not held live across both passes).
    per_row = dim_p * (2 * itemsize + 2 * itemsize + 4)
    br = max(budget_bytes // max(per_row, 1), 16)
    br -= br % 16                       # multiple of 16 (bf16 sublane packing)

    rows_up = ((rows + 15) // 16) * 16
    br = min(br, rows_up)
    br = max(br, 16)

    # On multi-TC chips (v7x) keep the "parallel" row axis splittable into
    # num_tc balanced chunks; on 1-TC chips prefer one big step.
    if num_tc > 1 and rows_up >= 16 * num_tc:
        balanced = (((rows_up + num_tc - 1) // num_tc + 15) // 16) * 16
        br = min(br, max(balanced, 16))
    return br


def rmsnorm(x, weight, *, eps: float = 1e-6, block_rows: int | None = None):
    """x: (..., dim) any float dtype; weight: (dim,). Same shape/dtype as x."""
    orig_shape = x.shape
    dim = orig_shape[-1]
    x2d = x.reshape(-1, dim)
    rows = x2d.shape[0]

    vmem_phys, num_tc = _tpu_vmem_and_cores()
    vmem_limit = (vmem_phys * 3) // 4          # 48 MiB on v7x, 96 MiB on v5e/v6e
    tile_budget = (vmem_phys * 3) // 8         # 24 MiB on v7x, 48 MiB on v5e/v6e

    # Fold the unit offset once, in f32 (matches (1 + weight.float()) exactly).
    w_plus1 = (1.0 + weight.astype(jnp.float32)).reshape(1, dim)

    if block_rows is None:
        block_rows = _choose_block_rows(rows, dim, x.dtype, tile_budget, num_tc)

    grid = (pl.cdiv(rows, block_rows),)
    out = pl.pallas_call(
        functools.partial(_rmsnorm_kernel, eps=eps, inv_dim=1.0 / dim),
        out_shape=jax.ShapeDtypeStruct((rows, dim), x.dtype),
        grid_spec=pltpu.PrefetchScalarGridSpec(
            num_scalar_prefetch=0,
            grid=grid,
            in_specs=[
                pl.BlockSpec((block_rows, dim), lambda i: (i, 0)),
                pl.BlockSpec((1, dim), lambda i: (0, 0)),
            ],
            out_specs=pl.BlockSpec((block_rows, dim), lambda i: (i, 0)),
        ),
        compiler_params=pltpu.CompilerParams(
            dimension_semantics=("parallel",),
            vmem_limit_bytes=int(vmem_limit),
        ),
    )(x2d, w_plus1)

    return out.reshape(orig_shape)


def rmsnorm_ref(x, weight, eps=1e-6):
    """Pure-JAX reference mirroring the PyTorch forward exactly."""
    xf = x.astype(jnp.float32)
    out = xf * jax.lax.rsqrt(jnp.mean(xf * xf, axis=-1, keepdims=True) + eps)
    out = out * (1.0 + weight.astype(jnp.float32))
    return out.astype(x.dtype)


if __name__ == "__main__":
    key = jax.random.PRNGKey(0)
    k1, k2, k3 = jax.random.split(key, 3)

    # Shape consistent with the module: (batch, seq, dim).
    batch, seq, dim = 2, 8, 256
    x = jax.random.normal(k1, (batch, seq, dim), dtype=jnp.float32).astype(jnp.bfloat16)
    weight = jnp.ones((dim,), dtype=jnp.float32)      # nn.Parameter(torch.ones(dim))

    out = jax.block_until_ready(rmsnorm(x, weight, eps=1e-6))
    ref = rmsnorm_ref(x, weight, eps=1e-6)
    assert out.shape == x.shape and out.dtype == x.dtype
    err = jnp.max(jnp.abs(out.astype(jnp.float32) - ref.astype(jnp.float32)))
    assert err <= 2e-2, f"max abs error {err}"

    # Second shape: dim not a multiple of 128 (masked tail-lane path) and rows
    # not a multiple of 16 (masked partial row block).
    dim2 = 200
    x2 = jax.random.normal(k2, (3, 5, dim2), dtype=jnp.float32).astype(jnp.bfloat16)
    weight2 = 0.1 * jax.random.normal(k3, (dim2,), dtype=jnp.float32)
    out2 = jax.block_until_ready(rmsnorm(x2, weight2, eps=1e-6))
    ref2 = rmsnorm_ref(x2, weight2, eps=1e-6)
    assert out2.shape == x2.shape and out2.dtype == x2.dtype
    err2 = jnp.max(jnp.abs(out2.astype(jnp.float32) - ref2.astype(jnp.float32)))
    assert err2 <= 2e-2, f"max abs error {err2}"

    print("KERNEL_OK")
</pallas_src>

<mosaic_0001>
module attributes {stable_mosaic.version = 11 : i64} {
  func.func @_rmsnorm_kernel(%arg0: i32, %arg1: memref<16x256xbf16, #tpu.memory_space<vmem>>, %arg2: memref<1x256xf32, #tpu.memory_space<vmem>>, %arg3: memref<16x256xbf16, #tpu.memory_space<vmem>>) attributes {dimension_semantics = [#tpu.dimension_semantics<parallel>], iteration_bounds = array<i64: 1>, scalar_prefetch = 0 : i64, scratch_operands = 0 : i64, tpu.core_type = #tpu.core_type<tc>, window_params = [{transform_indices = @transform_0, window_bounds = array<i64: 16, 256>}, {pipeline_mode = #tpu.pipeline_mode<synchronous>, transform_indices = @transform_1, window_bounds = array<i64: 1, 256>}, {transform_indices = @transform_2, window_bounds = array<i64: 16, 256>}]} {
    %c0 = arith.constant 0 : index
    %c0_0 = arith.constant 0 : index
    %0 = vector.load %arg1[%c0, %c0_0] : memref<16x256xbf16, #tpu.memory_space<vmem>>, vector<16x256xbf16>
    %1 = arith.extf %0 : vector<16x256xbf16> to vector<16x256xf32>
    %2 = arith.mulf %1, %1 : vector<16x256xf32>
    %cst = arith.constant dense<0.000000e+00> : vector<16xf32>
    %3 = vector.multi_reduction <add>, %2, %cst [1] : vector<16x256xf32> to vector<16xf32>
    %4 = vector.shape_cast %3 : vector<16xf32> to vector<16x1xf32>
    %cst_1 = arith.constant 3.906250e-03 : f32
    %5 = vector.broadcast %cst_1 : f32 to vector<16x1xf32>
    %6 = arith.mulf %4, %5 : vector<16x1xf32>
    %cst_2 = arith.constant 9.99999997E-7 : f32
    %7 = vector.broadcast %cst_2 : f32 to vector<16x1xf32>
    %8 = arith.addf %6, %7 : vector<16x1xf32>
    %9 = math.rsqrt %8 : vector<16x1xf32>
    %c0_3 = arith.constant 0 : index
    %c0_4 = arith.constant 0 : index
    %10 = vector.load %arg1[%c0_3, %c0_4] : memref<16x256xbf16, #tpu.memory_space<vmem>>, vector<16x256xbf16>
    %11 = arith.extf %10 : vector<16x256xbf16> to vector<16x256xf32>
    %12 = vector.broadcast %9 : vector<16x1xf32> to vector<16x256xf32>
    %13 = arith.mulf %11, %12 : vector<16x256xf32>
    %c0_5 = arith.constant 0 : index
    %c0_6 = arith.constant 0 : index
    %14 = vector.load %arg2[%c0_5, %c0_6] : memref<1x256xf32, #tpu.memory_space<vmem>>, vector<1x256xf32>
    %15 = vector.broadcast %14 : vector<1x256xf32> to vector<16x256xf32>
    %16 = arith.mulf %13, %15 : vector<16x256xf32>
    %17 = arith.truncf %16 : vector<16x256xf32> to vector<16x256xbf16>
    %c0_7 = arith.constant 0 : index
    %c0_8 = arith.constant 0 : index
    %18 = vector.load %arg3[%c0_7, %c0_8] : memref<16x256xbf16, #tpu.memory_space<vmem>>, vector<16x256xbf16>
    tpu.vector_store %arg3[%c0_7, %c0_8], %17 {strides = array<i32>} : memref<16x256xbf16, #tpu.memory_space<vmem>>, vector<16x256xbf16>,
    return
  }
  func.func @transform_0(%arg0: i32) -> (i32, i32) {
    %c0_i32 = arith.constant 0 : i32
    %c0_i32_0 = arith.constant 0 : i32
    return %arg0, %c0_i32 : i32, i32
  }
  func.func @transform_1(%arg0: i32) -> (i32, i32) {
    %c0_i32 = arith.constant 0 : i32
    %c0_i32_0 = arith.constant 0 : i32
    %c0_i32_1 = arith.constant 0 : i32
    return %c0_i32, %c0_i32_0 : i32, i32
  }
  func.func @transform_2(%arg0: i32) -> (i32, i32) {
    %c0_i32 = arith.constant 0 : i32
    %c0_i32_0 = arith.constant 0 : i32
    return %arg0, %c0_i32 : i32, i32
  }
}

</mosaic_0001>

<bundles_post_ra>
// kernel: tpu_custom_call.1
= control target key start
LH: loop header
LB: loop body
LE: loop exit
PB: predicated region body
PF: predicated region fallthrough
CT: control target
= control target key end

     0   :  { %7 = vsyncpa [#allocation3], 0  ;;  %s226_s0 = inlined_call_operand.hbm [shape: bf16[16,256], index: 0, kind: input, shape index: {}]   ;;  %s227_s1 = inlined_call_operand.hbm [shape: f32[1,256], index: 1, kind: input, shape index: {}]   ;;  %s228_s2 = inlined_call_operand.hbm [shape: bf16[16,256], index: 2, kind: output, shape index: {}]  }
   0x1   :  { %8 = vsyncpa [#allocation6], 0 }
   0x2   :  { %9 = vsyncpa [#allocation4], 0  ;;  %s191_s9 = smov [#allocation2]  }
   0x3   :  { %s15_s10 = sshll.u32 %s191_s9, 4  ;;  %s16_s10 = int_to_ptr.vmem [resolvable:$true] %s15_s10 }
   0x4   :  { %s133_s11 = scalar_lea.vmem %s16_s10, 256  ;;  %p138_p1 = scmp.lt.s32.totalorder %s16_s10, %s16_s10 }
   0x5   :  { %p134_p0 = scmp.ne.s32.totalorder %s16_s10, %s133_s11  ;;  %p139_p2 = scmp.lt.s32.totalorder %s133_s11, %s133_s11 }
   0x7   :  { %p140_p3 = por %p139_p2, %p138_p1 }
   0x9   :  { %p141_p4 = pnand %p140_p3, %p134_p0 }
   0xb   :  { %144 = shalt.err (!%p141_p4)
}
   0xc   :  { %s192_s12 = smov 128   ;;  %s193_s13 = smov 8  }
   0xd   :  { %21 = dma.hbm_to_vmem [thread:$0]  %s226_s0, 256, %s16_s10, [#allocation3], %s192_s12, %s192_s12, %s193_s13  }
   0xe   :  { %s194_s16 = smov [#allocation5]  }
   0xf   :  { %s28_s17 = sshll.u32 %s194_s16, 4  ;;  %s29_s17 = int_to_ptr.vmem [resolvable:$true] %s28_s17 }
  0x10   :  { %s153_s18 = scalar_lea.vmem %s29_s17, 32  ;;  %p158_p6 = scmp.lt.s32.totalorder %s29_s17, %s29_s17 }
  0x11   :  { %p154_p5 = scmp.ne.s32.totalorder %s29_s17, %s153_s18  ;;  %p159_p7 = scmp.lt.s32.totalorder %s153_s18, %s153_s18 }
  0x13   :  { %p160_p8 = por %p159_p7, %p158_p6 }
  0x15   :  { %p161_p9 = pnand %p160_p8, %p154_p5 }
  0x17   :  { %164 = shalt.err (!%p161_p9)
}
  0x18   :  { %31 = dma.hbm_to_vmem [thread:$0]  %s227_s1, 32, %s29_s17, [#allocation6]  }
  0x19   :  { %185 = dma.done.wait [#allocation3], 256  }
  0x1a   :  { %186 = vsyncadd [#allocation3], 4294967040 }
  0x1b   :  { %187 = dma.done.wait [#allocation6], 32  }
  0x1c   :  { %188 = vsyncadd [#allocation6], 4294967264  ;;  %v38_v0 = vld [vmem:[#allocation2] sm:$0xff]  ;;  %v39_v1 = vld [vmem:[#allocation2 + $0x8] sm:$0xff]  ;;  %v66_v17 = vlaneseq  ;;  %s195_s0 = smov [#allocation7]  }
  0x1d   :  { %v40_v2 = vunpack.c.l.bf16 %v38_v0  ;;  %v41_v3 = vunpack.c.h.bf16 %v38_v0  ;;  %v42_v4 = vunpack.c.l.bf16 %v39_v1  ;;  %v43_v5 = vunpack.c.h.bf16 %v39_v1  ;;  %v64_v22 = vld [vmem:[#allocation5] sm:$0x3]  ;;  %s99_s1 = sshll.u32 %s195_s0, 4  ;;  %s100_s1 = int_to_ptr.vmem [resolvable:$true] %s99_s1 }
  0x1e   :  { %v67_v19 = vshrl.u32 %v66_v17, 7  ;;  %s165_s21 = scalar_lea.vmem %s100_s1, 256  ;;  %p170_p11 = scmp.lt.s32.totalorder %s100_s1, %s100_s1 }
  0x1f   :  { %v44_v6 = vmul.f32 %v40_v2, %v40_v2  ;;  %v45_v7 = vmul.f32 %v41_v3, %v41_v3  ;;  %v46_v8 = vmul.f32 %v42_v4, %v42_v4  ;;  %v47_v9 = vmul.f32 %v43_v5, %v43_v5  ;;  %p166_p10 = scmp.ne.s32.totalorder %s100_s1, %s165_s21  ;;  %p171_p12 = scmp.lt.s32.totalorder %s165_s21, %s165_s21 }
  0x20   :  { %v68_v20 = vsub.s32 0, %v67_v19  ;;  %v72_v21 = vsub.s32 1, %v67_v19 }
  0x21   :  { %v48_v10 = vadd.f32 %v45_v7, %v44_v6  ;;  %v51_v11 = vadd.f32 %v47_v9, %v46_v8  ;;  %p172_p13 = por %p171_p12, %p170_p11 }
  0x22   :  { %v69_v23 = vrot.slane %v64_v22, %v68_v20  ;;  %v73_v24 = vrot.slane %v64_v22, %v72_v21 }
  0x23   :  { %49 = vadd.xlane.f32.xlu0 %v48_v10  ;;  %p173_p0 = pnand %p172_p13, %p166_p10 }
  0x27   :  { %52 = vadd.xlane.f32.xlu0 %v51_v11 }
  0xac   :  { %v50_v12 = vpop.xlane.xlu0 %49 }
  0xad   :  { %v54_v13 = vmul.f32 0.00390625, %v50_v12 }
  0xaf   :  { %v56_v14 = vadd.f32 1e-06, %v54_v13 }
  0xb0   :  { %v53_v15 = vpop.xlane.xlu0 %52 }
  0xb1   :  { %121 = vrsqrt.f32 %v56_v14  ;;  %v55_v16 = vmul.f32 0.00390625, %v53_v15 }
  0xb3   :  { %v57_v18 = vadd.f32 1e-06, %v55_v16 }
  0xb5   :  { %123 = vrsqrt.f32 %v57_v18 }
  0xbe   :  { %v122_v25 = vpop.eup %121 }
  0xbf   :  { %v60_v26 = vmul.f32 %v122_v25, %v40_v2  ;;  %v61_v27 = vmul.f32 %v122_v25, %v41_v3 }
  0xc1   :  { %v76_v28 = vmul.f32 %v69_v23, %v60_v26  ;;  %v77_v29 = vmul.f32 %v73_v24, %v61_v27 }
  0xc2   :  { %v124_v30 = vpop.eup %123 }
  0xc3   :  { %v62_v31 = vmul.f32 %v124_v30, %v42_v4  ;;  %v63_v32 = vmul.f32 %v124_v30, %v43_v5  ;;  %v114_v33 = vpack.c.bf16 %v77_v29, %v76_v28 }
  0xc5   :  { %v78_v34 = vmul.f32 %v69_v23, %v62_v31  ;;  %v79_v35 = vmul.f32 %v73_v24, %v63_v32  ;;  %92 = vst [vmem:[#allocation7] sm:$0xff] %v114_v33 }
  0xc7   :  { %v115_v36 = vpack.c.bf16 %v79_v35, %v78_v34 }
  0xc9   :  { %93 = vst [vmem:[#allocation7 + $0x8] sm:$0xff] %v115_v36 }
  0xca   :  { %176 = shalt.err (!%p173_p0)
}
  0xcb   :  { %105 = dma.vmem_to_hbm [thread:$0]  %s100_s1, 256, %s228_s2, [#allocation4], %s192_s12, %s192_s12, %s193_s13  }
  0xcc   :  { %189 = dma.done.wait [#allocation4], 256  }
  0xcd   :  { %190 = vsyncadd [#allocation4], 4294967040 }
  0xce   :  { %109 = vsyncpa [#allocation3], 1 }
  0xcf   :  { %110 = vsyncpa [#allocation6], 1 }
  0xd0   :  { %111 = vsyncpa [#allocation4], 1 }

</bundles_post_ra>
